<compile_context>
chip_gen: v6e
topology: v6e:2x2x1
jax: 0.10.0
libtpu: 0.0.40
codegen_flags: <defaults>
</compile_context>

<pallas_src>
import functools

import jax
import jax.numpy as jnp
from jax.experimental import pallas as pl
from jax.experimental.pallas import tpu as pltpu


def _pixelnorm_kernel(x_ref, o_ref, *, eps):
    # x_ref / o_ref: (1, C, TW) block; normalize along the C (sublane) axis.
    x = x_ref[...].astype(jnp.float32)
    ss = jnp.sum(x * x, axis=1, keepdims=True)          # (1, 1, TW) — XLU reduce
    denom = jnp.maximum(jnp.sqrt(ss), jnp.float32(eps))  # F.normalize eps clamp
    o_ref[...] = (x / denom).astype(o_ref.dtype)


def _pick_tile_w(hw, c, itemsize, vmem_block_budget=2 * 1024 * 1024):
    """Largest lane-dense (multiple-of-128) tile width whose (C, tile_w) block
    stays within ~2 MiB of VMEM.  For H*W < 128 fall back to the full extent
    (full-extent last-dim blocks are exempt from the 128-divisibility rule)."""
    if hw < 128:
        return hw
    max_lanes = max(128, vmem_block_budget // max(1, c * itemsize))
    t = min(hw, max_lanes)
    t = max(128, (t // 128) * 128)
    return t


def pixel_norm(x, eps=1e-12):
    """F.normalize(x, p=2, dim=1) for an (N, C, ...) tensor via a Pallas TPU kernel."""
    assert x.ndim >= 2, "PixelNorm expects at least (N, C, ...)"
    N, C = x.shape[0], x.shape[1]
    spatial = 1
    for d in x.shape[2:]:
        spatial *= d
    x3 = x.reshape(N, C, spatial)

    tile_w = _pick_tile_w(spatial, C, x.dtype.itemsize)
    grid = (N, pl.cdiv(spatial, tile_w))

    out = pl.pallas_call(
        functools.partial(_pixelnorm_kernel, eps=eps),
        out_shape=jax.ShapeDtypeStruct((N, C, spatial), x.dtype),
        grid_spec=pltpu.PrefetchScalarGridSpec(
            num_scalar_prefetch=0,
            grid=grid,
            in_specs=[pl.BlockSpec((1, C, tile_w), lambda n, t: (n, 0, t))],
            out_specs=pl.BlockSpec((1, C, tile_w), lambda n, t: (n, 0, t)),
        ),
        compiler_params=pltpu.CompilerParams(
            dimension_semantics=("parallel", "parallel")),
    )(x3)
    return out.reshape(x.shape)


if __name__ == "__main__":
    key = jax.random.PRNGKey(0)
    x = jax.random.normal(key, (2, 4, 16, 16), dtype=jnp.float32)

    fwd = jax.jit(pixel_norm)
    out = jax.block_until_ready(fwd(x))
    assert out.shape == x.shape, out.shape

    # Pure-JAX reference of F.normalize(x, p=2, dim=1).
    norm = jnp.sqrt(jnp.sum(x * x, axis=1, keepdims=True))
    ref = x / jnp.maximum(norm, 1e-12)
    assert jnp.allclose(out, ref, rtol=1e-5, atol=1e-6), float(
        jnp.max(jnp.abs(out - ref)))
    print("KERNEL_OK")
</pallas_src>

<mosaic_0001>
module attributes {stable_mosaic.version = 11 : i64} {
  func.func @_pixelnorm_kernel(%arg0: i32, %arg1: i32, %arg2: memref<1x4x256xf32, #tpu.memory_space<vmem>>, %arg3: memref<1x4x256xf32, #tpu.memory_space<vmem>>) attributes {dimension_semantics = [#tpu.dimension_semantics<parallel>, #tpu.dimension_semantics<parallel>], iteration_bounds = array<i64: 2, 1>, scalar_prefetch = 0 : i64, scratch_operands = 0 : i64, tpu.core_type = #tpu.core_type<tc>, window_params = [{transform_indices = @transform_0, window_bounds = array<i64: 1, 4, 256>}, {transform_indices = @transform_1, window_bounds = array<i64: 1, 4, 256>}]} {
    %c0 = arith.constant 0 : index
    %c0_0 = arith.constant 0 : index
    %c0_1 = arith.constant 0 : index
    %0 = vector.load %arg2[%c0, %c0_0, %c0_1] : memref<1x4x256xf32, #tpu.memory_space<vmem>>, vector<1x4x256xf32>
    %1 = arith.mulf %0, %0 : vector<1x4x256xf32>
    %cst = arith.constant dense<0.000000e+00> : vector<1x256xf32>
    %2 = vector.multi_reduction <add>, %1, %cst [1] : vector<1x4x256xf32> to vector<1x256xf32>
    %3 = vector.shape_cast %2 : vector<1x256xf32> to vector<1x1x256xf32>
    %4 = math.sqrt %3 : vector<1x1x256xf32>
    %cst_2 = arith.constant 9.99999996E-13 : f32
    %5 = vector.broadcast %cst_2 : f32 to vector<1x1x256xf32>
    %6 = arith.maximumf %4, %5 : vector<1x1x256xf32>
    %7 = vector.broadcast %6 : vector<1x1x256xf32> to vector<1x4x256xf32>
    %8 = arith.divf %0, %7 : vector<1x4x256xf32>
    %c0_3 = arith.constant 0 : index
    %c0_4 = arith.constant 0 : index
    %c0_5 = arith.constant 0 : index
    %9 = vector.load %arg3[%c0_3, %c0_4, %c0_5] : memref<1x4x256xf32, #tpu.memory_space<vmem>>, vector<1x4x256xf32>
    tpu.vector_store %arg3[%c0_3, %c0_4, %c0_5], %8 {strides = array<i32>} : memref<1x4x256xf32, #tpu.memory_space<vmem>>, vector<1x4x256xf32>,
    return
  }
  func.func @transform_0(%arg0: i32, %arg1: i32) -> (i32, i32, i32) {
    %c0_i32 = arith.constant 0 : i32
    %c0_i32_0 = arith.constant 0 : i32
    return %arg0, %c0_i32, %arg1 : i32, i32, i32
  }
  func.func @transform_1(%arg0: i32, %arg1: i32) -> (i32, i32, i32) {
    %c0_i32 = arith.constant 0 : i32
    %c0_i32_0 = arith.constant 0 : i32
    return %arg0, %c0_i32, %arg1 : i32, i32, i32
  }
}

</mosaic_0001>

<bundles_post_ra>
// kernel: pixel_norm.1
= control target key start
LH: loop header
LB: loop body
LE: loop exit
PB: predicated region body
PF: predicated region fallthrough
CT: control target
= control target key end

     0   :  { %s363_s6 = smov 0   ;;  %s365_s7 = smov 0   ;;  %s403_s0 = inlined_call_operand.vmem [shape: f32[2,4,256], index: 0, kind: input, shape index: {}]   ;;  %s404_s1 = inlined_call_operand.vmem [shape: f32[2,4,256], index: 1, kind: output, shape index: {}]  }
   0x1   :  { %s367_s8 = smov 0  }
   0x2 LB: > { %s23_s9 = sadd.s32 1, %s347_s7  ;;  %p290_p0 = scmp.ge.s32.totalorder %s351_s8, 1  ;;  %s351_s8 = sphi %s367_s8, %s11_s8   ;;  %s347_s7 = sphi %s365_s7, %s406_s7   ;;  %s343_s6 = sphi %s363_s6, %s405_s6  }
   0x3   : > { %p25_p1 = scmp.ge.s32.totalorder %s23_s9, 2  ;;  %p108_p2 = scmp.lt.s32.totalorder %s351_s8, 3 }
   0x5   : > { %s408_s9 = smov (%p25_p1, %s23_s9), 0  ;;  %p109_p3 = pnand %p290_p0, %p108_p2 }
   0x6   : > { %p137_p4 = scmp.lt.s32.totalorder (!%p109_p3), %s343_s6, 1 }
   0x7   : > { %112 = sbr.rel (%p109_p3) target bundleno = 72 (0x48), region = 24 }
   0xc   : > { %s410_s6 = smov (!%p137_p4, %s343_s6), 1  ;;  %vm161_vm0 = vcmask 1043456  }
   0xd   : > { %s297_s10 = sshll.u32 %s410_s6, 3 }
   0xe   : > { %s144_s13 = scalar_lea.vmem %s403_s0, %s297_s10  ;;  %s154_s16 = scalar_lea.vmem %s404_s1, %s297_s10 }
   0xf   : > { %v156_v0 = vld [vmem:[%s144_s13] sm:$0xff] }
  0x10   : > { %v157_v1 = vmul.f32 %v156_v0, %v156_v0 }
  0x12   : > { %v159_v2 = vcombine.high %v157_v1, %v157_v1  ;;  %v162_v3 = vsel %vm161_vm0, %v157_v1, 0.0 }
  0x13   : > { %v163_v4 = vrot.slane %v162_v3, 4 }
  0x14   : > { %v169_v5 = vsel %vm161_vm0, %v159_v2, 0.0 }
  0x15   : > { %v164_v6 = vadd.f32 %v163_v4, %v162_v3  ;;  %v170_v7 = vrot.slane %v169_v5, 4 }
  0x17   : > { %v165_v8 = vrot.slane %v164_v6, 2  ;;  %v171_v9 = vadd.f32 %v170_v7, %v169_v5 }
  0x19   : > { %v166_v10 = vadd.f32 %v165_v8, %v164_v6  ;;  %v172_v11 = vrot.slane %v171_v9, 2 }
  0x1b   : > { %v167_v12 = vrot.slane %v166_v10, 1  ;;  %v173_v13 = vadd.f32 %v172_v11, %v171_v9 }
  0x1d   : > { %v168_v14 = vadd.f32 %v167_v12, %v166_v10  ;;  %v174_v15 = vrot.slane %v173_v13, 1 }
  0x1f   : > { %v175_v16 = vadd.f32 %v174_v15, %v173_v13  ;;  %323 = vrsqrt.f32 %v168_v14  ;;  %vm178_vm1 = vcmp.eq.f32.partialorder %v168_v14, inf  ;;  %v181_v18 = vand.u32 2147483648, %v168_v14 }
  0x20   : > { %vm180_vm2 = vcmp.eq.f32.partialorder %v168_v14, 0.0 }
  0x21   : > { %325 = vrsqrt.f32 %v175_v16  ;;  %vm185_vm3 = vcmp.eq.f32.partialorder %v175_v16, inf  ;;  %v188_v21 = vand.u32 2147483648, %v175_v16  ;;  %vm187_vm4 = vcmp.eq.f32.partialorder %v175_v16, 0.0 }
  0x2c   : > { %v324_v17 = vpop.eup %323 }
  0x2d   : > { %v177_v19 = vmul.f32 %v324_v17, %v168_v14 }
  0x2e   : > { %v326_v20 = vpop.eup %325 }
  0x2f   : > { %v179_v22 = vsel %vm178_vm1, %v168_v14, %v177_v19  ;;  %v184_v23 = vmul.f32 %v326_v20, %v175_v16 }
  0x30   : > { %v182_v24 = vsel %vm180_vm2, %v181_v18, %v179_v22 }
  0x31   : > { %v186_v25 = vsel %vm185_vm3, %v175_v16, %v184_v23  ;;  %v190_v26 = vmax.f32 %v182_v24, 1e-12 }
  0x32   : > { %v189_v27 = vsel %vm187_vm4, %v188_v21, %v186_v25 }
  0x33   : > { %v191_v28 = vmax.f32 %v189_v27, 1e-12 }
  0x35   : > { %v194_v29 = vcombine.low %v190_v26, %v191_v28 }
  0x37   : > { %327 = vrcp.f32 %v194_v29 }
  0x44   : > { %v328_v30 = vpop.eup %327 }
  0x45   : > { %v197_v31 = vmul.f32 %v328_v30, %v156_v0 }
  0x47   : > { %198 = vst [vmem:[%s154_s16] sm:$0xff] %v197_v31 }
  0x48 PF: > { %s11_s8 = sadd.s32 1, %s351_s8   ;;  %s405_s6 = smov %s347_s7 }
  0x49   : > { %p8_p5 = scmp.ge.s32.totalorder %s11_s8, 4   ;;  %s406_s7 = smov %s408_s9 }
  0x4b   :  { %10 = sbr.rel (!%p8_p5) target bundleno = 2 (0x2), region = 54 }

</bundles_post_ra>
